<compile_context>
chip_gen: v6e
topology: v6e:2x2x1
jax: 0.10.0
libtpu: 0.0.40
codegen_flags: <defaults>
</compile_context>

<pallas_src>
import numpy as np
import jax
import jax.numpy as jnp
from jax.experimental import pallas as pl
from jax.experimental.pallas import tpu as pltpu

LANE = 128
_SUBLANE_ALIGN = {1: 32, 2: 16, 4: 8, 8: 8}  # row alignment by dtype itemsize


def _cdiv(a, b):
    return -(-a // b)


def _round_up(a, b):
    return _cdiv(a, b) * b


# ---------------------------------------------------------------------------
# Host-side glue: nested-shape inference + ragged flattening
# ---------------------------------------------------------------------------
def _nested_shape(seq):
    """Max (padded) dense shape of a nested python sequence."""
    if not isinstance(seq, (list, tuple, np.ndarray)):
        return ()  # scalar leaf
    if len(seq) == 0:
        return (0,)
    subs = [_nested_shape(s) for s in seq]
    depths = {len(s) for s in subs}
    if len(depths) != 1:
        # TODO(synk): heterogeneous nesting depth (mixing scalars and lists) not supported
        raise ValueError("heterogeneous nesting depth not supported")
    d = depths.pop()
    maxes = tuple(max(s[k] for s in subs) for k in range(d))
    return (len(seq),) + maxes


def _gather_rows(seq, shape):
    """Flatten leaves row-by-row (row = innermost vector of the dense output).

    Missing subtrees become rows of length 0 (fully pad_value-filled).
    Returns (flat_values_list, per_row_lengths_list).
    """
    lead = shape[:-1]
    vals, lengths = [], []

    def rec(node, dims):
        if not dims:
            if node is None:
                lengths.append(0)
            else:
                lengths.append(len(node))
                vals.extend(list(node))
            return
        d = dims[0]
        for i in range(d):
            child = node[i] if (node is not None and i < len(node)) else None
            rec(child, dims[1:])

    rec(seq, list(lead))
    return vals, lengths


def _vmem_capacity_bytes():
    try:
        info = pltpu.get_tpu_info()
        cap = getattr(info, "vmem_capacity_bytes", None)
        if cap:
            return max(int(cap), 32 * 2**20)
    except Exception:
        pass
    return 64 * 2**20  # conservative fallback (v7x per-TC VMEM)


# ---------------------------------------------------------------------------
# Pallas kernel: one coalesced block in, mask to pad_value, one block out.
# ---------------------------------------------------------------------------
def _make_kernel(pad_const, col_tile):
    def kernel(len_ref, x_ref, o_ref):
        # len_ref: (1, R, 1) int32 per-row valid lengths for this row tile
        # x_ref / o_ref: (R, TL) data blocks (auto-pipelined, double-buffered)
        lens = len_ref[0]  # (R, 1)
        col0 = pl.program_id(1) * col_tile
        col = col0 + jax.lax.broadcasted_iota(jnp.int32, x_ref.shape, 1)
        o_ref[...] = jnp.where(col < lens, x_ref[...], pad_const)

    return kernel


def pad_and_stack_rec_pallas(sequence, pad_value, dtype=jnp.float32, tile_rows=None):
    if dtype is None:
        dtype = jnp.float32  # TODO(synk): torch infers dtype from data; default f32 here
    np_dtype = np.dtype(dtype)

    shape = _nested_shape(sequence)
    if len(shape) == 0:
        # Scalar input: 0-d result, no meaningful kernel path.
        return jnp.asarray(sequence, dtype=np_dtype)

    vals, lengths = _gather_rows(sequence, shape)
    L = int(shape[-1])
    rows = int(np.prod(shape[:-1])) if len(shape) > 1 else 1
    if rows == 0 or L == 0:
        return jnp.full(shape, pad_value, dtype=np_dtype)

    itemsize = np_dtype.itemsize
    align = _SUBLANE_ALIGN.get(itemsize, 8)
    cap = _vmem_capacity_bytes()
    ws_budget = min(24 * 2**20, int(0.4 * cap))  # per-step working-set target

    # ---- lane (column) tiling: keep very long rows VMEM-friendly ----
    TL_MAX = 8192
    n_lc = _cdiv(L, TL_MAX)
    TL = L if n_lc == 1 else _round_up(_cdiv(L, n_lc), LANE)
    num_lchunks = _cdiv(L, TL)
    lane_w = max(LANE, _round_up(TL, LANE))
    bytes_per_row = lane_w * itemsize  # VMEM bytes per row per buffer

    # ---- row tiling (dtype-aware alignment, VMEM-budget driven) ----
    if tile_rows is not None:
        R = int(tile_rows)
        assert R == rows or R % align == 0, "tile_rows must equal rows or be sublane-aligned"
    elif rows <= align:
        R = rows  # block dim == full array dim (legal even if not aligned)
    else:
        r_fit = max(align, ws_budget // (4 * bytes_per_row))  # 2x in + 2x out buffers
        R = int(min(1024, r_fit))
        R = max(align, (R // align) * align)
        if _cdiv(rows, R) < 2:
            # Give both v7x TensorCores a tile when there is enough work.
            R = max(align, min(R, _round_up(_cdiv(rows, 2), align)))
    num_tiles = _cdiv(rows, R)
    rows_padded = num_tiles * R

    # ---- host flattening: left-justified ragged rows at fixed stride L ----
    lengths_np = np.zeros(rows_padded, dtype=np.int32)
    lengths_np[:rows] = np.asarray(lengths, dtype=np.int32)
    total = int(lengths_np[:rows].sum())
    assert total == len(vals)

    buf = np.zeros((rows, L), dtype=np_dtype)
    if total:
        lr = lengths_np[:rows].astype(np.int64)
        starts = np.zeros(rows, dtype=np.int64)
        starts[1:] = np.cumsum(lr[:-1])
        row_ids = np.repeat(np.arange(rows, dtype=np.int64), lr)
        col_ids = np.arange(total, dtype=np.int64) - np.repeat(starts, lr)
        buf[row_ids, col_ids] = np.asarray(vals, dtype=np_dtype)

    len_col = lengths_np.reshape(num_tiles, R, 1)
    pad_const = np.asarray(pad_value, dtype=np_dtype)  # host-side dtype cast

    grid_spec = pltpu.PrefetchScalarGridSpec(
        num_scalar_prefetch=0,
        grid=(num_tiles, num_lchunks),
        in_specs=[
            pl.BlockSpec((1, R, 1), lambda t, c: (t, 0, 0)),  # per-tile lengths (tiny)
            pl.BlockSpec((R, TL), lambda t, c: (t, c)),       # coalesced data block
        ],
        out_specs=pl.BlockSpec((R, TL), lambda t, c: (t, c)),
    )

    # VMEM limit: enough for the pipelined buffers + headroom, but always well
    # below physical capacity (v7x: 64 MiB total per TC).
    needed = 4 * R * bytes_per_row + 4 * R * LANE * 4 + (2 << 20)
    vmem_limit = int(min(int(0.75 * cap), max(16 * 2**20, 2 * needed)))

    out = pl.pallas_call(
        _make_kernel(pad_const, TL),
        out_shape=jax.ShapeDtypeStruct((rows, L), np_dtype),
        grid_spec=grid_spec,
        compiler_params=pltpu.CompilerParams(
            dimension_semantics=("parallel", "parallel"),  # row tiles / lane chunks independent
            vmem_limit_bytes=vmem_limit,
        ),
    )(jnp.asarray(len_col), jnp.asarray(buf))

    # (rows, L) is contiguous -> reshape to the nested dense shape is free metadata.
    return out.reshape(shape)


class PadAndStackRec:
    """Mirror of torchoutil.nn.PadAndStackRec (forward only)."""

    def __init__(self, pad_value, *, dtype=None):
        self.pad_value = pad_value
        self.dtype = dtype

    def __call__(self, sequence):
        return pad_and_stack_rec_pallas(sequence, self.pad_value, dtype=self.dtype)


# ---------------------------------------------------------------------------
# Demo / self-check
# ---------------------------------------------------------------------------
if __name__ == "__main__":
    # Check 1: small ragged nested structure (single tile, L < 128).
    key = jax.random.PRNGKey(0)
    raw = np.asarray(jax.random.normal(key, (64,), dtype=jnp.float32))

    inner_lengths = [[3, 1], [2, 4, 1]]
    it = iter(raw.tolist())
    sequence = [[[next(it) for _ in range(l)] for l in row] for row in inner_lengths]

    pad_value = -1.0
    module = PadAndStackRec(pad_value)
    out = jax.block_until_ready(module(sequence))

    dense_shape = (2, 3, 4)
    ref = np.full(dense_shape, pad_value, dtype=np.float32)
    for i, row in enumerate(sequence):
        for j, inner in enumerate(row):
            ref[i, j, : len(inner)] = inner

    assert out.shape == dense_shape, (out.shape, dense_shape)
    assert out.dtype == jnp.float32
    assert np.allclose(np.asarray(out), ref), "mismatch vs reference (check 1)"

    # Check 2: multi-tile grid with a partial last tile (rows=21, tile_rows=8),
    # including zero-length and missing rows.
    key2 = jax.random.PRNGKey(1)
    raw2 = np.asarray(jax.random.normal(key2, (256,), dtype=jnp.float32))
    it2 = iter(raw2.tolist())
    inner_lengths2 = [[3, 10, 0, 7], [1, 2], [9, 9, 9, 4, 6, 5, 2]]
    seq2 = [[[next(it2) for _ in range(l)] for l in row] for row in inner_lengths2]

    out2 = jax.block_until_ready(
        pad_and_stack_rec_pallas(seq2, 0.5, dtype=jnp.float32, tile_rows=8)
    )
    shape2 = (3, 7, 10)
    ref2 = np.full(shape2, 0.5, dtype=np.float32)
    for i, row in enumerate(seq2):
        for j, inner in enumerate(row):
            ref2[i, j, : len(inner)] = inner
    assert out2.shape == shape2, (out2.shape, shape2)
    assert np.allclose(np.asarray(out2), ref2), "mismatch vs reference (check 2)"

    # Check 3: integer (token-id style) padding.
    seq3 = [[1, 2, 3], [4], [5, 6, 7, 8]]
    out3 = jax.block_until_ready(pad_and_stack_rec_pallas(seq3, -1, dtype=jnp.int32))
    ref3 = np.array([[1, 2, 3, -1], [4, -1, -1, -1], [5, 6, 7, 8]], dtype=np.int32)
    assert out3.shape == (3, 4)
    assert np.array_equal(np.asarray(out3), ref3), "mismatch vs reference (check 3)"

    print("KERNEL_OK")
</pallas_src>

<mosaic_0001>
module attributes {stable_mosaic.version = 11 : i64} {
  func.func @kernel(%arg0: i32, %arg1: i32, %arg2: memref<1x6x1xi32, #tpu.memory_space<vmem>>, %arg3: memref<6x4xf32, #tpu.memory_space<vmem>>, %arg4: memref<6x4xf32, #tpu.memory_space<vmem>>) attributes {dimension_semantics = [#tpu.dimension_semantics<parallel>, #tpu.dimension_semantics<parallel>], iteration_bounds = array<i64: 1, 1>, scalar_prefetch = 0 : i64, scratch_operands = 0 : i64, tpu.core_type = #tpu.core_type<tc>, window_params = [{transform_indices = @transform_0, window_bounds = array<i64: 1, 6, 1>}, {transform_indices = @transform_1, window_bounds = array<i64: 6, 4>}, {transform_indices = @transform_2, window_bounds = array<i64: 6, 4>}]} {
    %c0 = arith.constant 0 : index
    %c0_0 = arith.constant 0 : index
    %c0_1 = arith.constant 0 : index
    %0 = vector.load %arg2[%c0, %c0_0, %c0_1] : memref<1x6x1xi32, #tpu.memory_space<vmem>>, vector<1x6x1xi32>
    %1 = vector.shape_cast %0 : vector<1x6x1xi32> to vector<6x1xi32>
    %c4_i32 = arith.constant 4 : i32
    %2 = arith.muli %arg1, %c4_i32 : i32
    %3 = tpu.iota {dimensions = array<i32: 1>} : vector<6x4xi32>
    %4 = vector.broadcast %2 : i32 to vector<6x4xi32>
    %5 = arith.addi %4, %3 : vector<6x4xi32>
    %6 = vector.broadcast %1 : vector<6x1xi32> to vector<6x4xi32>
    %7 = arith.cmpi slt, %5, %6 : vector<6x4xi32>
    %c0_2 = arith.constant 0 : index
    %c0_3 = arith.constant 0 : index
    %8 = vector.load %arg3[%c0_2, %c0_3] : memref<6x4xf32, #tpu.memory_space<vmem>>, vector<6x4xf32>
    %cst = arith.constant -1.000000e+00 : f32
    %9 = vector.broadcast %cst : f32 to vector<6x4xf32>
    %10 = arith.select %7, %8, %9 : vector<6x4xi1>, vector<6x4xf32>
    %c0_4 = arith.constant 0 : index
    %c0_5 = arith.constant 0 : index
    %11 = vector.load %arg4[%c0_4, %c0_5] : memref<6x4xf32, #tpu.memory_space<vmem>>, vector<6x4xf32>
    tpu.vector_store %arg4[%c0_4, %c0_5], %10 {strides = array<i32>} : memref<6x4xf32, #tpu.memory_space<vmem>>, vector<6x4xf32>,
    return
  }
  func.func @transform_0(%arg0: i32, %arg1: i32) -> (i32, i32, i32) {
    %c0_i32 = arith.constant 0 : i32
    %c0_i32_0 = arith.constant 0 : i32
    %c0_i32_1 = arith.constant 0 : i32
    return %arg0, %c0_i32, %c0_i32_0 : i32, i32, i32
  }
  func.func @transform_1(%arg0: i32, %arg1: i32) -> (i32, i32) {
    %c0_i32 = arith.constant 0 : i32
    return %arg0, %arg1 : i32, i32
  }
  func.func @transform_2(%arg0: i32, %arg1: i32) -> (i32, i32) {
    %c0_i32 = arith.constant 0 : i32
    return %arg0, %arg1 : i32, i32
  }
}

</mosaic_0001>

<bundles_post_ra>
// kernel: tpu_custom_call.1
= control target key start
LH: loop header
LB: loop body
LE: loop exit
PB: predicated region body
PF: predicated region fallthrough
CT: control target
= control target key end

     0   :  { %v31_v0 = vmov 0   ;;  %v13_v2 = vlaneseq  ;;  %vm23_vm0 = vcmask 29696   ;;  %s56_s0 = inlined_call_operand.vmem [shape: s32[1,6,1], index: 0, kind: input, shape index: {}]   ;;  %s57_s1 = inlined_call_operand.vmem [shape: f32[6,4], index: 1, kind: input, shape index: {}]   ;;  %s58_s2 = inlined_call_operand.vmem [shape: f32[6,4], index: 2, kind: output, shape index: {}]  }
   0x1   :  { %30 = vset.pattern.permute.xlu0 %v31_v0  ;;  %v11_v1 = vld [vmem:[%s56_s0] sm:$0x3f] }
   0x2   :  { %18 = vperm.xlu0 %30, %v11_v1   ;;  %v14_v3 = vand.u32 127, %v13_v2  ;;  %v21_v4 = vld [vmem:[%s57_s1] sm:$0x3f] }
  0x7d   :  { %v19_v5 = vpop.permute.xlu0 %18 }
  0x7e   :  { %vm20_vm1 = vcmp.lt.s32.totalorder %v14_v3, %v19_v5 }
  0x7f   :  { %v22_v6 = vsel %vm20_vm1, %v21_v4, -1.0 }
  0x80   :  { %24 = vst.msk [vmem:[%s58_s2] sm:$0x3f] %vm23_vm0, %v22_v6 }

</bundles_post_ra>
